<compile_context>
chip_gen: v7x
topology: tpu7x:2x2x1
jax: 0.10.0
libtpu: 0.0.40
codegen_flags: <defaults>
</compile_context>

<pallas_src>
import functools

import jax
import jax.numpy as jnp
from jax import lax
from jax.experimental import pallas as pl
from jax.experimental.pallas import tpu as pltpu

EPS = 1e-5                      # nn.BatchNorm3d default eps
LANE = 128
TM_MAX = 1024                   # rows per tile; multiple of 16 (bf16 sublane packing)
VMEM_LIMIT = 32 * 1024 * 1024   # <= scoped default on v6e/v7x, fine on v5e


# ----------------------------------------------------------------- helpers ---
def _round_up(v, m):
    return (v + m - 1) // m * m


def _pick_tiles(m_rows, tm_max=TM_MAX):
    """Balanced M tiling: tm is a multiple of 16, Mp a multiple of tm."""
    n_t = -(-m_rows // tm_max)
    tm = _round_up(-(-m_rows // n_t), 16)
    mp = _round_up(m_rows, tm)
    return tm, mp, mp // tm


def _pad_to(a, rows, cols):
    return jnp.pad(a, ((0, rows - a.shape[0]), (0, cols - a.shape[1])))


def _prep_x(x2, mp, kp):
    if x2.shape != (mp, kp):
        x2 = _pad_to(x2, mp, kp)
    return x2.astype(jnp.bfloat16)


def _prep_w(w2, kp, cp):
    return _pad_to(w2.astype(jnp.float32), kp, cp).astype(jnp.bfloat16)


def _pad_vec(v, cp):
    return _pad_to(v.astype(jnp.float32).reshape(1, -1), 1, cp)


# ----------------------------------------------------------------- kernels ---
def _row_mask(z, tm, m_valid):
    """Zero rows past the true row count (keeps padded rows out of downstream stats)."""
    row = pl.program_id(0) * tm + lax.broadcasted_iota(jnp.int32, (z.shape[0], 1), 0)
    return jnp.where(row < m_valid, z, 0.0)


def _stats_kernel(x_ref, w_ref, sum_ref, sq_ref):
    """Phase A: per-tile partial channel sums / sum-of-squares of y = X @ W.
    Padded rows/cols of X and W are zero, so they contribute nothing."""
    y = jnp.dot(x_ref[...], w_ref[...], preferred_element_type=jnp.float32)
    sum_ref[...] = jnp.sum(y, axis=0, keepdims=True)
    sq_ref[...] = jnp.sum(y * y, axis=0, keepdims=True)


def _norm_kernel(x_ref, w_ref, sc_ref, sh_ref, o_ref, *, tm, m_valid, mask_rows):
    """Phase B: recompute y = X @ W, apply precomputed BN affine + ReLU, store."""
    y = jnp.dot(x_ref[...], w_ref[...], preferred_element_type=jnp.float32)
    z = jnp.maximum(y * sc_ref[...] + sh_ref[...], 0.0)
    if mask_rows:
        z = _row_mask(z, tm, m_valid)
    o_ref[...] = z.astype(o_ref.dtype)


def _norm_stats_kernel(x_ref, wa_ref, sca_ref, sha_ref, wb_ref, sum_ref, sq_ref,
                       *, tm, m_valid, mask_rows):
    """Stage-2 normalize recompute (VMEM only, never stored) feeding stage-3 partial
    batch statistics of y3 = relu(bn2(X @ W2)) @ W3."""
    y = jnp.dot(x_ref[...], wa_ref[...], preferred_element_type=jnp.float32)
    z = jnp.maximum(y * sca_ref[...] + sha_ref[...], 0.0)
    if mask_rows:
        z = _row_mask(z, tm, m_valid)        # padded rows must not pollute stats
    y2 = jnp.dot(z.astype(jnp.bfloat16), wb_ref[...],
                 preferred_element_type=jnp.float32)
    sum_ref[...] = jnp.sum(y2, axis=0, keepdims=True)
    sq_ref[...] = jnp.sum(y2 * y2, axis=0, keepdims=True)


def _norm_norm_kernel(x_ref, wa_ref, sca_ref, sha_ref, wb_ref, scb_ref, shb_ref,
                      o_ref, *, tm, m_valid, mask_rows):
    """Fused stage-2 + stage-3 normalize: the stage-2 activation never touches HBM."""
    y = jnp.dot(x_ref[...], wa_ref[...], preferred_element_type=jnp.float32)
    z = jnp.maximum(y * sca_ref[...] + sha_ref[...], 0.0)
    if mask_rows:
        z = _row_mask(z, tm, m_valid)
    y2 = jnp.dot(z.astype(jnp.bfloat16), wb_ref[...],
                 preferred_element_type=jnp.float32)
    o_ref[...] = jnp.maximum(y2 * scb_ref[...] + shb_ref[...], 0.0).astype(o_ref.dtype)


# --------------------------------------------------------- pallas_call glue ---
def _call(kernel, grid, in_specs, out_specs, out_shape):
    return pl.pallas_call(
        kernel,
        out_shape=out_shape,
        grid_spec=pltpu.PrefetchScalarGridSpec(
            num_scalar_prefetch=0, grid=grid,
            in_specs=in_specs, out_specs=out_specs),
        compiler_params=pltpu.CompilerParams(
            dimension_semantics=("parallel",) * len(grid),
            vmem_limit_bytes=VMEM_LIMIT),
    )


def _x_spec(tm, kp):
    return pl.BlockSpec((tm, kp), lambda i: (i, 0))


def _full_spec(r, c):
    return pl.BlockSpec((r, c), lambda i: (0, 0))


def _stat_spec(cp):
    return pl.BlockSpec((None, 1, cp), lambda i: (i, 0, 0))


def _stat_shape(n_tiles, cp):
    return jax.ShapeDtypeStruct((n_tiles, 1, cp), jnp.float32)


def _affine_from_stats(sums, sqs, gamma, beta, m_valid, cp):
    """Reduce per-tile partials -> BN (scale, shift): z = y*scale + shift."""
    inv_m = 1.0 / float(m_valid)
    mean = jnp.sum(sums, axis=0) * inv_m                              # (1, cp)
    var = jnp.maximum(jnp.sum(sqs, axis=0) * inv_m - mean * mean, 0.0)
    rstd = lax.rsqrt(var + EPS)
    scale = _pad_vec(gamma, cp) * rstd        # padded channels -> scale = shift = 0
    shift = _pad_vec(beta, cp) - mean * scale
    return scale, shift


# --------------------------------------------------------------- stage glue ---
def _matmul_bn_relu(x2, w2, gamma, beta, *, m_valid, out_dtype):
    """Two-phase tiled  X @ W + BatchNorm(batch stats) + ReLU.
    Returns the row-/lane-padded (Mp, Cp) slab; padded rows/cols are exact zeros."""
    m_rows = max(x2.shape[0], m_valid)
    tm, mp, n_tiles = _pick_tiles(m_rows)
    kp = _round_up(x2.shape[1], LANE)
    cp = _round_up(w2.shape[1], LANE)
    mask_rows = mp != m_valid

    xp = _prep_x(x2, mp, kp)
    wp = _prep_w(w2, kp, cp)

    sums, sqs = _call(
        _stats_kernel, (n_tiles,),
        [_x_spec(tm, kp), _full_spec(kp, cp)],
        (_stat_spec(cp), _stat_spec(cp)),
        (_stat_shape(n_tiles, cp), _stat_shape(n_tiles, cp)),
    )(xp, wp)
    scale, shift = _affine_from_stats(sums, sqs, gamma, beta, m_valid, cp)

    kern = functools.partial(_norm_kernel, tm=tm, m_valid=m_valid, mask_rows=mask_rows)
    return _call(
        kern, (n_tiles,),
        [_x_spec(tm, kp), _full_spec(kp, cp), _full_spec(1, cp), _full_spec(1, cp)],
        pl.BlockSpec((tm, cp), lambda i: (i, 0)),
        jax.ShapeDtypeStruct((mp, cp), out_dtype),
    )(xp, wp, scale, shift)


def _fused_deconv_conv_bn_relu(patches, w2, g2, b2, w3, g3, b3, *, m_valid, out_dtype):
    """ConvTranspose3d-as-matmul + BN + ReLU fused with the following 1x1 Conv3d +
    BN + ReLU.  Three tiled, megacore-parallel passes over the patch matrix; the
    stage-2 activation is recomputed per tile and never written to HBM."""
    m_rows = max(patches.shape[0], m_valid)
    tm, mp, n_tiles = _pick_tiles(m_rows)
    kp = _round_up(patches.shape[1], LANE)
    c2p = _round_up(w2.shape[1], LANE)
    c3p = _round_up(w3.shape[1], LANE)
    mask_rows = mp != m_valid

    xp = _prep_x(patches, mp, kp)
    w2p = _prep_w(w2, kp, c2p)
    w3p = _prep_w(w3, c2p, c3p)

    # pass 1: stage-2 batch statistics
    sums2, sqs2 = _call(
        _stats_kernel, (n_tiles,),
        [_x_spec(tm, kp), _full_spec(kp, c2p)],
        (_stat_spec(c2p), _stat_spec(c2p)),
        (_stat_shape(n_tiles, c2p), _stat_shape(n_tiles, c2p)),
    )(xp, w2p)
    sc2, sh2 = _affine_from_stats(sums2, sqs2, g2, b2, m_valid, c2p)

    # pass 2: stage-3 batch statistics on the in-VMEM stage-2 activation
    kern = functools.partial(_norm_stats_kernel, tm=tm, m_valid=m_valid,
                             mask_rows=mask_rows)
    sums3, sqs3 = _call(
        kern, (n_tiles,),
        [_x_spec(tm, kp), _full_spec(kp, c2p), _full_spec(1, c2p),
         _full_spec(1, c2p), _full_spec(c2p, c3p)],
        (_stat_spec(c3p), _stat_spec(c3p)),
        (_stat_shape(n_tiles, c3p), _stat_shape(n_tiles, c3p)),
    )(xp, w2p, sc2, sh2, w3p)
    sc3, sh3 = _affine_from_stats(sums3, sqs3, g3, b3, m_valid, c3p)

    # pass 3: normalize both stages, store only the final output
    kern = functools.partial(_norm_norm_kernel, tm=tm, m_valid=m_valid,
                             mask_rows=mask_rows)
    return _call(
        kern, (n_tiles,),
        [_x_spec(tm, kp), _full_spec(kp, c2p), _full_spec(1, c2p),
         _full_spec(1, c2p), _full_spec(c2p, c3p), _full_spec(1, c3p),
         _full_spec(1, c3p)],
        pl.BlockSpec((tm, c3p), lambda i: (i, 0)),
        jax.ShapeDtypeStruct((mp, c3p), out_dtype),
    )(xp, w2p, sc2, sh2, w3p, sc3, sh3)


# ----------------------------------------------------------------- forward ---
def linknet_up3d(x, params, *, kernel_size, stride, padding, output_padding):
    """linknetUp3D forward.  x: (N, Cin, D, H, W) f32 (torch NCDHW)."""
    N, Cin, D, H, W = x.shape
    mid = params["w1"].shape[0]
    Cout = params["w3"].shape[0]
    k, s, p, op = kernel_size, stride, padding, output_padding

    # ---- stage 1: 1x1x1 Conv3d + BN + ReLU (pure per-voxel matmul) --------------
    # Conv/deconv biases are intentionally dropped: a per-channel bias cancels
    # exactly under BatchNorm batch statistics (the reference keeps them, matches).
    # TODO(synk): only valid for training-mode BN; eval-mode (running stats) would
    # need the bias folded into `shift` instead.
    M1 = N * D * H * W
    a = x.transpose(0, 2, 3, 4, 1).reshape(M1, Cin)                   # channels-last
    w1 = params["w1"].reshape(mid, Cin).T                             # (Cin, mid)
    a = _matmul_bn_relu(a, w1, params["g1"], params["b1"],
                        m_valid=M1, out_dtype=jnp.bfloat16)
    a = a[:M1, :mid].reshape(N, D, H, W, mid)                         # bf16

    # ---- stage 2+3: ConvTranspose3d + BN + ReLU, then 1x1 Conv3d + BN + ReLU -----
    # Transposed conv == stride-1 conv over the stride-dilated, edge-padded input
    # with the spatially-flipped, (in,out)-swapped kernel.
    assert k - 1 - p >= 0, "padding > kernel_size - 1 is not supported"
    Dd, Hd, Wd = (D - 1) * s + 1, (H - 1) * s + 1, (W - 1) * s + 1
    z = jnp.zeros((N, Dd, Hd, Wd, mid), a.dtype).at[:, ::s, ::s, ::s, :].set(a)
    lo, hi = k - 1 - p, k - 1 - p + op
    zp = jnp.pad(z, ((0, 0), (lo, hi), (lo, hi), (lo, hi), (0, 0)))
    Do, Ho, Wo = Dd + lo + hi - k + 1, Hd + lo + hi - k + 1, Wd + lo + hi - k + 1
    # TODO(synk): move this im2col into the kernel (k^3 taps as a reduction grid axis
    # with shifted-window index_maps, plus the stride-parity s^3 decomposition) so
    # the bf16 patch matrix never materializes in HBM.
    cols = []
    for kd in range(k):
        for kh in range(k):
            for kw in range(k):
                cols.append(zp[:, kd:kd + Do, kh:kh + Ho, kw:kw + Wo, :])
    M2 = N * Do * Ho * Wo
    patches = jnp.stack(cols, axis=4).reshape(M2, k * k * k * mid)    # bf16
    wt = params["w2"][:, :, ::-1, ::-1, ::-1]            # (in, out, k, k, k) flipped
    w2 = wt.transpose(2, 3, 4, 0, 1).reshape(k * k * k * mid, mid)
    w3 = params["w3"].reshape(Cout, mid).T                            # (mid, Cout)
    out = _fused_deconv_conv_bn_relu(
        patches, w2, params["g2"], params["b2"], w3, params["g3"], params["b3"],
        m_valid=M2, out_dtype=jnp.float32)
    out = out[:M2, :Cout].reshape(N, Do, Ho, Wo, Cout)
    return out.transpose(0, 4, 1, 2, 3)                               # back to NCDHW


# --------------------------------------------------------------- reference ---
def _rb16(a):
    """Round to bf16 and back: emulates the kernel's bf16 MXU operands."""
    return a.astype(jnp.bfloat16).astype(jnp.float32)


def _bn_relu_ref(y, gamma, beta):
    mean = y.mean(axis=(0, 2, 3, 4), keepdims=True)
    var = ((y - mean) ** 2).mean(axis=(0, 2, 3, 4), keepdims=True)    # biased
    zn = (y - mean) * lax.rsqrt(var + EPS)
    zn = zn * gamma.reshape(1, -1, 1, 1, 1) + beta.reshape(1, -1, 1, 1, 1)
    return jnp.maximum(zn, 0.0)


def _reference(x, params, *, kernel_size, stride, padding, output_padding):
    k, s, p, op = kernel_size, stride, padding, output_padding
    dn = ("NCDHW", "OIDHW", "NCDHW")
    y = lax.conv_general_dilated(
        _rb16(x), _rb16(params["w1"]), (1, 1, 1), [(0, 0)] * 3,
        dimension_numbers=lax.conv_dimension_numbers(x.shape, params["w1"].shape, dn))
    y = y + params["bias1"].reshape(1, -1, 1, 1, 1)
    a = _bn_relu_ref(y, params["g1"], params["b1"])
    wc = params["w2"].transpose(1, 0, 2, 3, 4)[:, :, ::-1, ::-1, ::-1]
    y = lax.conv_general_dilated(
        _rb16(a), _rb16(wc), (1, 1, 1),
        [(k - 1 - p, k - 1 - p + op)] * 3, lhs_dilation=(s, s, s),
        dimension_numbers=lax.conv_dimension_numbers(a.shape, wc.shape, dn))
    y = y + params["bias2"].reshape(1, -1, 1, 1, 1)
    a = _bn_relu_ref(y, params["g2"], params["b2"])
    y = lax.conv_general_dilated(
        _rb16(a), _rb16(params["w3"]), (1, 1, 1), [(0, 0)] * 3,
        dimension_numbers=lax.conv_dimension_numbers(a.shape, params["w3"].shape, dn))
    y = y + params["bias3"].reshape(1, -1, 1, 1, 1)
    return _bn_relu_ref(y, params["g3"], params["b3"])


# -------------------------------------------------------------------- main ---
if __name__ == "__main__":
    # linknetUp3D(in_planes=16, out_planes=8, kernel_size=3, stride=2,
    #             padding=1, output_padding=1);  mid = in_planes // 4 = 4
    N, D, H, W = 2, 8, 8, 8
    in_planes, out_planes = 16, 8
    k_size, stride, padding, output_padding = 3, 2, 1, 1
    mid = in_planes // 4

    key = jax.random.PRNGKey(0)
    ks = jax.random.split(key, 12)
    x = jax.random.normal(ks[0], (N, in_planes, D, H, W), dtype=jnp.float32)

    def uinit(kk, shape, fan_in):
        b = 1.0 / jnp.sqrt(float(fan_in))
        return jax.random.uniform(kk, shape, minval=-b, maxval=b, dtype=jnp.float32)

    params = {
        # Conv3d(in_planes, mid, k=1): torch layout (out, in, kD, kH, kW)
        "w1": uinit(ks[1], (mid, in_planes, 1, 1, 1), in_planes),
        "bias1": uinit(ks[2], (mid,), in_planes),
        "g1": 1.0 + 0.1 * jax.random.normal(ks[3], (mid,), dtype=jnp.float32),
        "b1": 0.1 * jax.random.normal(ks[4], (mid,), dtype=jnp.float32),
        # ConvTranspose3d(mid, mid, k, s, p, op): torch layout (in, out, kD, kH, kW)
        "w2": uinit(ks[5], (mid, mid, k_size, k_size, k_size), mid * k_size ** 3),
        "bias2": uinit(ks[6], (mid,), mid * k_size ** 3),
        "g2": 1.0 + 0.1 * jax.random.normal(ks[7], (mid,), dtype=jnp.float32),
        "b2": 0.1 * jax.random.normal(ks[8], (mid,), dtype=jnp.float32),
        # Conv3d(mid, out_planes, k=1)
        "w3": uinit(ks[9], (out_planes, mid, 1, 1, 1), mid),
        "bias3": uinit(ks[10], (out_planes,), mid),
        "g3": 1.0 + 0.1 * jax.random.normal(ks[11], (out_planes,), dtype=jnp.float32),
        "b3": jnp.zeros((out_planes,), jnp.float32),
    }

    out = linknet_up3d(x, params, kernel_size=k_size, stride=stride,
                       padding=padding, output_padding=output_padding)
    out = jax.block_until_ready(out)

    ref = jax.block_until_ready(
        _reference(x, params, kernel_size=k_size, stride=stride,
                   padding=padding, output_padding=output_padding))

    Do = (D - 1) * stride - 2 * padding + k_size + output_padding
    assert out.shape == (N, out_planes, Do, Do, Do), out.shape
    max_err = float(jnp.max(jnp.abs(out - ref)))
    assert max_err < 1e-2, f"mismatch vs reference: max_err={max_err}"

    print("KERNEL_OK")
</pallas_src>

<mosaic_0001>
module attributes {stable_mosaic.version = 11 : i64} {
  func.func @_stats_kernel(%arg0: i32, %arg1: memref<1024x128xbf16, #tpu.memory_space<vmem>>, %arg2: memref<128x128xbf16, #tpu.memory_space<vmem>>, %arg3: memref<1x1x128xf32, #tpu.memory_space<vmem>>, %arg4: memref<1x1x128xf32, #tpu.memory_space<vmem>>) attributes {dimension_semantics = [#tpu.dimension_semantics<parallel>], iteration_bounds = array<i64: 1>, scalar_prefetch = 0 : i64, scratch_operands = 0 : i64, tpu.core_type = #tpu.core_type<tc>, window_params = [{transform_indices = @transform_0, window_bounds = array<i64: 1024, 128>}, {pipeline_mode = #tpu.pipeline_mode<synchronous>, transform_indices = @transform_1, window_bounds = array<i64: 128, 128>}, {transform_indices = @transform_2, window_bounds = array<i64: 1, 1, 128>}, {transform_indices = @transform_3, window_bounds = array<i64: 1, 1, 128>}]} {
    %c0 = arith.constant 0 : index
    %c0_0 = arith.constant 0 : index
    %0 = vector.load %arg1[%c0, %c0_0] : memref<1024x128xbf16, #tpu.memory_space<vmem>>, vector<1024x128xbf16>
    %c0_1 = arith.constant 0 : index
    %c0_2 = arith.constant 0 : index
    %1 = vector.load %arg2[%c0_1, %c0_2] : memref<128x128xbf16, #tpu.memory_space<vmem>>, vector<128x128xbf16>
    %cst = arith.constant dense<0.000000e+00> : vector<1024x128xf32>
    %2 = tpu.matmul %0, %1, %cst {dimension_numbers = #tpu.dot_dimension_numbers<[1], [0], [0], [1], [0, 0, 1, 1], [], []>} : vector<1024x128xbf16>, vector<128x128xbf16>, vector<1024x128xf32> -> vector<1024x128xf32>
    %cst_3 = arith.constant dense<0.000000e+00> : vector<128xf32>
    %3 = vector.multi_reduction <add>, %2, %cst_3 [0] : vector<1024x128xf32> to vector<128xf32>
    %4 = vector.shape_cast %3 : vector<128xf32> to vector<1x128xf32>
    %c0_4 = arith.constant 0 : index
    %c0_5 = arith.constant 0 : index
    %c0_6 = arith.constant 0 : index
    %5 = vector.load %arg3[%c0_4, %c0_5, %c0_6] : memref<1x1x128xf32, #tpu.memory_space<vmem>>, vector<1x1x128xf32>
    %6 = vector.shape_cast %5 : vector<1x1x128xf32> to vector<1x128xf32>
    %7 = vector.shape_cast %4 : vector<1x128xf32> to vector<1x1x128xf32>
    tpu.vector_store %arg3[%c0_4, %c0_5, %c0_6], %7 {strides = array<i32>} : memref<1x1x128xf32, #tpu.memory_space<vmem>>, vector<1x1x128xf32>,
    %8 = arith.mulf %2, %2 : vector<1024x128xf32>
    %cst_7 = arith.constant dense<0.000000e+00> : vector<128xf32>
    %9 = vector.multi_reduction <add>, %8, %cst_7 [0] : vector<1024x128xf32> to vector<128xf32>
    %10 = vector.shape_cast %9 : vector<128xf32> to vector<1x128xf32>
    %c0_8 = arith.constant 0 : index
    %c0_9 = arith.constant 0 : index
    %c0_10 = arith.constant 0 : index
    %11 = vector.load %arg4[%c0_8, %c0_9, %c0_10] : memref<1x1x128xf32, #tpu.memory_space<vmem>>, vector<1x1x128xf32>
    %12 = vector.shape_cast %11 : vector<1x1x128xf32> to vector<1x128xf32>
    %13 = vector.shape_cast %10 : vector<1x128xf32> to vector<1x1x128xf32>
    tpu.vector_store %arg4[%c0_8, %c0_9, %c0_10], %13 {strides = array<i32>} : memref<1x1x128xf32, #tpu.memory_space<vmem>>, vector<1x1x128xf32>,
    return
  }
  func.func @transform_0(%arg0: i32) -> (i32, i32) {
    %c0_i32 = arith.constant 0 : i32
    %c0_i32_0 = arith.constant 0 : i32
    return %arg0, %c0_i32 : i32, i32
  }
  func.func @transform_1(%arg0: i32) -> (i32, i32) {
    %c0_i32 = arith.constant 0 : i32
    %c0_i32_0 = arith.constant 0 : i32
    %c0_i32_1 = arith.constant 0 : i32
    return %c0_i32, %c0_i32_0 : i32, i32
  }
  func.func @transform_2(%arg0: i32) -> (i32, i32, i32) {
    %c0_i32 = arith.constant 0 : i32
    %c0_i32_0 = arith.constant 0 : i32
    %c0_i32_1 = arith.constant 0 : i32
    return %arg0, %c0_i32, %c0_i32_0 : i32, i32, i32
  }
  func.func @transform_3(%arg0: i32) -> (i32, i32, i32) {
    %c0_i32 = arith.constant 0 : i32
    %c0_i32_0 = arith.constant 0 : i32
    %c0_i32_1 = arith.constant 0 : i32
    return %arg0, %c0_i32, %c0_i32_0 : i32, i32, i32
  }
}

</mosaic_0001>

<bundles_post_ra>
// kernel: tpu_custom_call.1
= control target key start
LH: loop header
LB: loop body
LE: loop exit
PB: predicated region body
PF: predicated region fallthrough
CT: control target
= control target key end

     0   :  { %9 = vsyncpa [#allocation3], 0  ;;  %s2471_s0 = inlined_call_operand.hbm [shape: bf16[1024,128], index: 0, kind: input, shape index: {}]   ;;  %s2472_s1 = inlined_call_operand.hbm [shape: bf16[128,128], index: 1, kind: input, shape index: {}]   ;;  %s2473_s2 = inlined_call_operand.hbm [shape: f32[1,1,128], index: 2, kind: output, shape index: {0}]   ;;  %s2474_s3 = inlined_call_operand.hbm [shape: f32[1,1,128], index: 3, kind: output, shape index: {1}]  }
   0x1   :  { %10 = vsyncpa [#allocation6], 0 }
   0x2   :  { %11 = vsyncpa [#allocation4], 0 }
   0x3   :  { %12 = vsyncpa [#allocation9], 0  ;;  %s2069_s12 = smov [#allocation2]   ;;  %s1973_s16 = scalar_lea.hbm %s2471_s0, 8192 }
   0x4   :  { %s18_s13 = sshll.u32 %s2069_s12, 4  ;;  %p1974_p0 = scmp.ne.s32.totalorder %s2471_s0, %s1973_s16  ;;  %s19_s13 = int_to_ptr.vmem [resolvable:$true] %s18_s13 }
   0x5   :  { %p1977_p1 = scmp.lt.u32.totalorder %s1973_s16, %s2471_s0 }
   0x7   :  { %p1979_p2 = pnand %p1977_p1, %p1974_p0 }
   0x9   :  { %1982 = shalt.err (!%p1979_p2)
}
   0xa   :  { %s1983_s21 = scalar_lea.vmem %s19_s13, 8192  ;;  %p1988_p4 = scmp.lt.s32.totalorder %s19_s13, %s19_s13 }
   0xb   :  { %p1984_p3 = scmp.ne.s32.totalorder %s19_s13, %s1983_s21  ;;  %p1989_p5 = scmp.lt.s32.totalorder %s1983_s21, %s1983_s21 }
   0xd   :  { %p1990_p6 = por %p1989_p5, %p1988_p4 }
   0xf   :  { %p1991_p7 = pnand %p1990_p6, %p1984_p3 }
  0x11   :  { %1994 = shalt.err (!%p1991_p7)
}
  0x12   :  { %s2070_s22 = smov 64   ;;  %s2071_s23 = smov 4  }
  0x13   :  { %24 = dma.hbm_to_vmem [thread:$0]  %s2471_s0, 8192, %s19_s13, [#allocation3], %s2070_s22, %s2070_s22, %s2071_s23  }
  0x14   :  { %s2072_s26 = smov [#allocation5]   ;;  %s1995_s30 = scalar_lea.hbm %s2472_s1, 1024 }
  0x15   :  { %s30_s27 = sshll.u32 %s2072_s26, 4  ;;  %p1996_p8 = scmp.ne.s32.totalorder %s2472_s1, %s1995_s30  ;;  %s31_s27 = int_to_ptr.vmem [resolvable:$true] %s30_s27 }
  0x16   :  { %p1999_p9 = scmp.lt.u32.totalorder %s1995_s30, %s2472_s1 }
  0x18   :  { %p2001_p10 = pnand %p1999_p9, %p1996_p8 }
  0x1a   :  { %2004 = shalt.err (!%p2001_p10)
}
  0x1b   :  { %s2005_s8 = scalar_lea.vmem %s31_s27, 1024  ;;  %p2010_p12 = scmp.lt.s32.totalorder %s31_s27, %s31_s27 }
  0x1c   :  { %p2006_p11 = scmp.ne.s32.totalorder %s31_s27, %s2005_s8  ;;  %p2011_p13 = scmp.lt.s32.totalorder %s2005_s8, %s2005_s8 }
  0x1e   :  { %p2012_p0 = por %p2011_p13, %p2010_p12 }
  0x20   :  { %p2013_p1 = pnand %p2012_p0, %p2006_p11 }
  0x22   :  { %2016 = shalt.err (!%p2013_p1)
}
  0x23   :  { %36 = dma.hbm_to_vmem [thread:$0]  %s2472_s1, 1024, %s31_s27, [#allocation6], %s2070_s22, %s2070_s22, %s2071_s23  }
  0x24   :  { %2061 = dma.done.wait [#allocation3], 8192  }
  0x25   :  { %2062 = vsyncadd [#allocation3], 4294959104 }
  0x26   :  { %2063 = dma.done.wait [#allocation6], 1024  }
  0x27   :  { %2064 = vsyncadd [#allocation6], 4294966272  ;;  %v1901_v0 = vld [vmem:[#allocation5] sm:$0xff]   ;;  %v1902_v1 = vld [vmem:[#allocation5 + $0x8] sm:$0xff]   ;;  %s2073_s1 = smov [#allocation7]   ;;  %s2074_s11 = smov [#allocation8]  }
  0x28   :  { %1735 = vmatprep.subr.bf16.mxu0 %v1901_v0  ;;  %1879 = vmatprep.subr.bf16.mxu1 %v1901_v0  ;;  %v1903_v2 = vld [vmem:[#allocation5 + $0x10] sm:$0xff]   ;;  %v1904_v3 = vld [vmem:[#allocation5 + $0x18] sm:$0xff]   ;;  %v1909_v4 = vld [vmem:[#allocation2] sm:$0xff]   ;;  %s1567_s10 = sshll.u32 %s2073_s1, 4  ;;  %s1577_s12 = sshll.u32 %s2074_s11, 4  ;;  %s1568_s10 = int_to_ptr.vmem [resolvable:$true] %s1567_s10  ;;  %s2439_s12 = int_to_ptr.vmem [resolvable:$true] %s1577_s12 }
  0x29   :  { %1736 = vmatpush3.bf16.msra.mxu0 %v1901_v0  ;;  %1887 = vmatpush3.bf16.msra.mxu1 %v1901_v0  ;;  %v1905_v5 = vld [vmem:[#allocation5 + $0x20] sm:$0xff]   ;;  %v1906_v6 = vld [vmem:[#allocation5 + $0x28] sm:$0xff]   ;;  %v1907_v7 = vld [vmem:[#allocation5 + $0x30] sm:$0xff]   ;;  %s2017_s13 = scalar_lea.vmem %s1568_s10, 16  ;;  %s2021_s14 = scalar_lea.vmem %s1568_s10, 32 }
  0x2a   :  { %1737 = vmatprep.subr.bf16.mxu0 %v1902_v1  ;;  %1880 = vmatprep.subr.bf16.mxu1 %v1902_v1  ;;  %v1908_v8 = vld [vmem:[#allocation5 + $0x38] sm:$0xff]   ;;  %v1910_v9 = vld [vmem:[#allocation2 + $0x8] sm:$0xff]   ;;  %v1911_v10 = vld [vmem:[#allocation2 + $0x10] sm:$0xff]   ;;  %p2018_p2 = scmp.ne.s32.totalorder %s1568_s10, %s2017_s13  ;;  %p2022_p3 = scmp.lt.s32.totalorder %s1568_s10, %s1568_s10 }
  0x2b   :  { %1751 = vmatprep.mubr.bf16.mxu0 %v1909_v4  ;;  %v1912_v11 = vld [vmem:[#allocation2 + $0x18] sm:$0xff]   ;;  %v1913_v12 = vld [vmem:[#allocation2 + $0x20] sm:$0xff]   ;;  %v1942_v14 = vld [vmem:[#allocation2 + $0x108] sm:$0xff]   ;;  %p2023_p4 = scmp.lt.s32.totalorder %s2021_s14, %s2017_s13 }
  0x2c   :  { %v1941_v13 = vld [vmem:[#allocation2 + $0x100] sm:$0xff]   ;;  %v1943_v15 = vld [vmem:[#allocation2 + $0x110] sm:$0xff]   ;;  %v1914_v16 = vld [vmem:[#allocation2 + $0x28] sm:$0xff]  }
  0x2d   :  { %1738 = vmatpush3.bf16.msra.mxu0 %v1902_v1  ;;  %1888 = vmatpush3.bf16.msra.mxu1 %v1902_v1  ;;  %v1915_v17 = vld [vmem:[#allocation2 + $0x30] sm:$0xff]   ;;  %v1944_v18 = vld [vmem:[#allocation2 + $0x118] sm:$0xff]   ;;  %v1945_v19 = vld [vmem:[#allocation2 + $0x120] sm:$0xff]   ;;  %p2024_p5 = por %p2023_p4, %p2022_p3 }
  0x2e   :  { %1739 = vmatprep.subr.bf16.mxu0 %v1903_v2  ;;  %1881 = vmatprep.subr.bf16.mxu1 %v1903_v2  ;;  %v1916_v20 = vld [vmem:[#allocation2 + $0x38] sm:$0xff]   ;;  %v1917_v21 = vld [vmem:[#allocation2 + $0x40] sm:$0xff]   ;;  %v1946_v22 = vld [vmem:[#allocation2 + $0x128] sm:$0xff]  }
  0x2f   :  { %1815 = vmatprep.mubr.bf16.mxu1 %v1941_v13  ;;  %v1947_v23 = vld [vmem:[#allocation2 + $0x130] sm:$0xff]   ;;  %v1918_v24 = vld [vmem:[#allocation2 + $0x48] sm:$0xff]   ;;  %v1948_v26 = vld [vmem:[#allocation2 + $0x138] sm:$0xff]   ;;  %p2025_p6 = pnand %p2024_p5, %p2018_p2 }
  0x30   :  { %v1919_v25 = vld [vmem:[#allocation2 + $0x50] sm:$0xff]   ;;  %v1949_v27 = vld [vmem:[#allocation2 + $0x140] sm:$0xff]   ;;  %v1920_v28 = vld [vmem:[#allocation2 + $0x58] sm:$0xff]  }
  0x31   :  { %1740 = vmatpush3.bf16.msra.mxu0 %v1903_v2  ;;  %1889 = vmatpush3.bf16.msra.mxu1 %v1903_v2  ;;  %v1921_v29 = vld [vmem:[#allocation2 + $0x60] sm:$0xff]   ;;  %v1950_v30 = vld [vmem:[#allocation2 + $0x148] sm:$0xff]   ;;  %v1951_v31 = vld [vmem:[#allocation2 + $0x150] sm:$0xff]  }
  0x32   :  { %1741 = vmatprep.subr.bf16.mxu0 %v1904_v3  ;;  %1882 = vmatprep.subr.bf16.mxu1 %v1904_v3  ;;  %v1922_v32 = vld [vmem:[#allocation2 + $0x68] sm:$0xff]   ;;  %v1923_v33 = vld [vmem:[#allocation2 + $0x70] sm:$0xff]   ;;  %v1952_v34 = vld [vmem:[#allocation2 + $0x158] sm:$0xff]  }
  0x33   :  { %v1953_v35 = vld [vmem:[#allocation2 + $0x160] sm:$0xff]   ;;  %v1924_v36 = vld [vmem:[#allocation2 + $0x78] sm:$0xff]   ;;  %v1954_v38 = vld [vmem:[#allocation2 + $0x168] sm:$0xff]  }
  0x34   :  { %v1925_v37 = vld [vmem:[#allocation2 + $0x80] sm:$0xff]   ;;  %v1955_v39 = vld [vmem:[#allocation2 + $0x170] sm:$0xff]   ;;  %v1926_v40 = vld [vmem:[#allocation2 + $0x88] sm:$0xff]  }
  0x35   :  { %1742 = vmatpush3.bf16.msra.mxu0 %v1904_v3  ;;  %1890 = vmatpush3.bf16.msra.mxu1 %v1904_v3  ;;  %v1927_v41 = vld [vmem:[#allocation2 + $0x90] sm:$0xff]   ;;  %v1956_v42 = vld [vmem:[#allocation2 + $0x178] sm:$0xff]   ;;  %v1957_v43 = vld [vmem:[#allocation2 + $0x180] sm:$0xff]  }
  0x36   :  { %1743 = vmatprep.subr.bf16.mxu0 %v1905_v5  ;;  %1883 = vmatprep.subr.bf16.mxu1 %v1905_v5  ;;  %v1928_v44 = vld [vmem:[#allocation2 + $0x98] sm:$0xff]   ;;  %v1929_v45 = vld [vmem:[#allocation2 + $0xa0] sm:$0xff]   ;;  %v1958_v46 = vld [vmem:[#allocation2 + $0x188] sm:$0xff]  }
  0x37   :  { %v1959_v47 = vld [vmem:[#allocation2 + $0x190] sm:$0xff]   ;;  %v1930_v48 = vld [vmem:[#allocation2 + $0xa8] sm:$0xff]   ;;  %v1960_v50 = vld [vmem:[#allocation2 + $0x198] sm:$0xff]  }
  0x38   :  { %v1931_v49 = vld [vmem:[#allocation2 + $0xb0] sm:$0xff]   ;;  %v1961_v51 = vld [vmem:[#allocation2 + $0x1a0] sm:$0xff]   ;;  %v1932_v52 = vld [vmem:[#allocation2 + $0xb8] sm:$0xff]  }
  0x39   :  { %1744 = vmatpush3.bf16.msra.mxu0 %v1905_v5  ;;  %1891 = vmatpush3.bf16.msra.mxu1 %v1905_v5  ;;  %v1933_v53 = vld [vmem:[#allocation2 + $0xc0] sm:$0xff]   ;;  %v1962_v54 = vld [vmem:[#allocation2 + $0x1a8] sm:$0xff]   ;;  %v1963_v55 = vld [vmem:[#allocation2 + $0x1b0] sm:$0xff]  }
  0x3a   :  { %1745 = vmatprep.subr.bf16.mxu0 %v1906_v6  ;;  %1884 = vmatprep.subr.bf16.mxu1 %v1906_v6  ;;  %v1934_v56 = vld [vmem:[#allocation2 + $0xc8] sm:$0xff]   ;;  %v1935_v57 = vld [vmem:[#allocation2 + $0xd0] sm:$0xff]   ;;  %v1964_v58 = vld [vmem:[#allocation2 + $0x1b8] sm:$0xff]  }
  0x3b   :  { %v1965_v59 = vld [vmem:[#allocation2 + $0x1c0] sm:$0xff]   ;;  %v1936_v60 = vld [vmem:[#allocation2 + $0xd8] sm:$0xff]   ;;  %v1966_v62 = vld [vmem:[#allocation2 + $0x1c8] sm:$0xff]  }
  0x3c   :  { %v1937_v61 = vld [vmem:[#allocation2 + $0xe0] sm:$0xff]   ;;  %v1967_v63 = vld [vmem:[#allocation2 + $0x1d0] sm:$0xff]   ;;  %v1938_v0 = vld [vmem:[#allocation2 + $0xe8] sm:$0xff]  }
  0x3d   :  { %1746 = vmatpush3.bf16.msra.mxu0 %v1906_v6  ;;  %1892 = vmatpush3.bf16.msra.mxu1 %v1906_v6  ;;  %v1939_v1 = vld [vmem:[#allocation2 + $0xf0] sm:$0xff]   ;;  %v1968_v2 = vld [vmem:[#allocation2 + $0x1d8] sm:$0xff]   ;;  %v1969_v3 = vld [vmem:[#allocation2 + $0x1e0] sm:$0xff]  }
  0x3e   :  { %1747 = vmatprep.subr.bf16.mxu0 %v1907_v7  ;;  %1885 = vmatprep.subr.bf16.mxu1 %v1907_v7  ;;  %v1940_v4 = vld [vmem:[#allocation2 + $0xf8] sm:$0xff]   ;;  %v1970_v5 = vld [vmem:[#allocation2 + $0x1e8] sm:$0xff]   ;;  %v1971_v6 = vld [vmem:[#allocation2 + $0x1f0] sm:$0xff]  }
  0x41   :  { %1748 = vmatpush3.bf16.msra.mxu0 %v1907_v7  ;;  %1893 = vmatpush3.bf16.msra.mxu1 %v1907_v7  ;;  %v1972_v7 = vld [vmem:[#allocation2 + $0x1f8] sm:$0xff]  }
  0x42   :  { %1749 = vmatprep.subr.bf16.mxu0 %v1908_v8  ;;  %1886 = vmatprep.subr.bf16.mxu1 %v1908_v8 }
  0x45   :  { %1750 = vmatpush3.bf16.msra.mxu0 %v1908_v8  ;;  %1894 = vmatpush3.bf16.msra.mxu1 %v1908_v8 }
  0x48   :  { %1752 = vmatmul.mubr.bf16.vlgmr.msra.gmra.mrb[0].mxu0 %v1910_v9  ;;  %1816 = vmatmul.mubr.bf16.vlgmr.msra.gmra.mrb[0].mxu1 %v1942_v14 }
  0x49   :  { %1755 = vmatprep.mubr.bf16.mxu0 %v1911_v10  ;;  %1819 = vmatprep.mubr.bf16.mxu1 %v1943_v15 }
  0x50   :  { %1756 = vmatmul.mubr.bf16.gmra.mrb[4].mxu0 %v1912_v11  ;;  %1820 = vmatmul.mubr.bf16.gmra.mrb[4].mxu1 %v1944_v18 }
  0x51   :  { %1759 = vmatprep.mubr.bf16.mxu0 %v1913_v12  ;;  %1823 = vmatprep.mubr.bf16.mxu1 %v1945_v19 }
  0x58   :  { %1760 = vmatmul.mubr.bf16.gmra.mrb[8].mxu0 %v1914_v16  ;;  %1824 = vmatmul.mubr.bf16.gmra.mrb[8].mxu1 %v1946_v22 }
  0x59   :  { %1763 = vmatprep.mubr.bf16.mxu0 %v1915_v17  ;;  %1827 = vmatprep.mubr.bf16.mxu1 %v1947_v23 }
  0x60   :  { %1764 = vmatmul.mubr.bf16.gmra.mrb[12].mxu0 %v1916_v20  ;;  %1828 = vmatmul.mubr.bf16.gmra.mrb[12].mxu1 %v1948_v26 }
  0x61   :  { %1767 = vmatprep.mubr.bf16.mxu0 %v1917_v21  ;;  %1831 = vmatprep.mubr.bf16.mxu1 %v1949_v27 }
  0x68   :  { %1768 = vmatmul.mubr.bf16.gmra.mrb[16].mxu0 %v1918_v24  ;;  %1832 = vmatmul.mubr.bf16.gmra.mrb[16].mxu1 %v1950_v30 }
  0x69   :  { %1771 = vmatprep.mubr.bf16.mxu0 %v1919_v25  ;;  %1835 = vmatprep.mubr.bf16.mxu1 %v1951_v31 }
  0x70   :  { %1772 = vmatmul.mubr.bf16.gmra.mrb[20].mxu0 %v1920_v28  ;;  %1836 = vmatmul.mubr.bf16.gmra.mrb[20].mxu1 %v1952_v34 }
  0x71   :  { %1775 = vmatprep.mubr.bf16.mxu0 %v1921_v29  ;;  %1839 = vmatprep.mubr.bf16.mxu1 %v1953_v35 }
  0x78   :  { %1776 = vmatmul.mubr.bf16.gmra.mrb[24].mxu0 %v1922_v32  ;;  %1840 = vmatmul.mubr.bf16.gmra.mrb[24].mxu1 %v1954_v38 }
  0x79   :  { %1779 = vmatprep.mubr.bf16.mxu0 %v1923_v33  ;;  %1843 = vmatprep.mubr.bf16.mxu1 %v1955_v39 }
  0x80   :  { %1780 = vmatmul.mubr.bf16.gmra.mrb[28].mxu0 %v1924_v36  ;;  %1844 = vmatmul.mubr.bf16.gmra.mrb[28].mxu1 %v1956_v42 }
  0x81   :  { %1783 = vmatprep.mubr.bf16.mxu0 %v1925_v37  ;;  %1847 = vmatprep.mubr.bf16.mxu1 %v1957_v43 }
  0x88   :  { %1784 = vmatmul.mubr.bf16.gmra.mrb[32].mxu0 %v1926_v40  ;;  %1848 = vmatmul.mubr.bf16.gmra.mrb[32].mxu1 %v1958_v46 }
  0x89   :  { %1787 = vmatprep.mubr.bf16.mxu0 %v1927_v41  ;;  %1851 = vmatprep.mubr.bf16.mxu1 %v1959_v47 }
  0x90   :  { %1788 = vmatmul.mubr.bf16.gmra.mrb[36].mxu0 %v1928_v44  ;;  %1852 = vmatmul.mubr.bf16.gmra.mrb[36].mxu1 %v1960_v50 }
  0x91   :  { %1791 = vmatprep.mubr.bf16.mxu0 %v1929_v45  ;;  %1855 = vmatprep.mubr.bf16.mxu1 %v1961_v51 }
  0x98   :  { %1792 = vmatmul.mubr.bf16.gmra.mrb[40].mxu0 %v1930_v48  ;;  %1856 = vmatmul.mubr.bf16.gmra.mrb[40].mxu1 %v1962_v54 }
  0x99   :  { %1795 = vmatprep.mubr.bf16.mxu0 %v1931_v49  ;;  %1859 = vmatprep.mubr.bf16.mxu1 %v1963_v55 }
  0xa0   :  { %1796 = vmatmul.mubr.bf16.gmra.mrb[44].mxu0 %v1932_v52  ;;  %1860 = vmatmul.mubr.bf16.gmra.mrb[44].mxu1 %v1964_v58 }
  0xa1   :  { %1799 = vmatprep.mubr.bf16.mxu0 %v1933_v53  ;;  %1863 = vmatprep.mubr.bf16.mxu1 %v1965_v59 }
  0xa8   :  { %1800 = vmatmul.mubr.bf16.gmra.mrb[48].mxu0 %v1934_v56  ;;  %1864 = vmatmul.mubr.bf16.gmra.mrb[48].mxu1 %v1966_v62 }
  0xa9   :  { %1803 = vmatprep.mubr.bf16.mxu0 %v1935_v57  ;;  %1867 = vmatprep.mubr.bf16.mxu1 %v1967_v63 }
  0xb0   :  { %1804 = vmatmul.mubr.bf16.gmra.mrb[52].mxu0 %v1936_v60  ;;  %1868 = vmatmul.mubr.bf16.gmra.mrb[52].mxu1 %v1968_v2 }
  0xb1   :  { %1807 = vmatprep.mubr.bf16.mxu0 %v1937_v61  ;;  %1871 = vmatprep.mubr.bf16.mxu1 %v1969_v3 }
  0xb8   :  { %1808 = vmatmul.mubr.bf16.gmra.mrb[56].mxu0 %v1938_v0  ;;  %1872 = vmatmul.mubr.bf16.gmra.mrb[56].mxu1 %v1970_v5 }
  0xb9   :  { %1811 = vmatprep.mubr.bf16.mxu0 %v1939_v1  ;;  %1875 = vmatprep.mubr.bf16.mxu1 %v1971_v6 }
  0xc0   :  { %1812 = vmatmul.mubr.bf16.gmra.mrb[60].mxu0 %v1940_v4  ;;  %1876 = vmatmul.mubr.bf16.gmra.mrb[60].mxu1 %v1972_v7 }
 0x11b   :  { %v1753_v8 = vpop.f32.mrb[0].mxu0  ;;  %v2119_v23 = vpop.f32.mrb[0].mxu1 }
 0x11c   :  { %v654_v9 = vpop.f32.mrb[1].mxu0  ;;  %v1301_v15 = vmul.f32 %v1753_v8, %v1753_v8  ;;  %v2121_v28 = vpop.f32.mrb[1].mxu1 }
 0x11d   :  { %v1754_v10 = vpop.f32.mrb[2].mxu0  ;;  %v1299_v12 = vmul.f32 %v654_v9, %v654_v9  ;;  %v2123_v30 = vpop.f32.mrb[2].mxu1 }
 0x11e   :  { %v657_v11 = vpop.f32.mrb[3].mxu0  ;;  %v1302_v18 = vmul.f32 %v1754_v10, %v1754_v10  ;;  %v2125_v34 = vpop.f32.mrb[3].mxu1 }
 0x11f   :  { %v1165_v13 = vadd.f32 %v657_v11, %v654_v9  ;;  %v1300_v14 = vmul.f32 %v657_v11, %v657_v11 }
 0x121   :  { %v1166_v16 = vadd.f32 %v1753_v8, %v1165_v13  ;;  %v1427_v17 = vadd.f32 %v1300_v14, %v1299_v12 }
 0x123   :  { %v1167_v19 = vadd.f32 %v1754_v10, %v1166_v16  ;;  %v1428_v20 = vadd.f32 %v1427_v17, %v1301_v15  ;;  %v1757_v21 = vpop.f32.mrb[4].mxu0  ;;  %v2127_v43 = vpop.f32.mrb[4].mxu1 }
 0x124   :  { %v670_v22 = vpop.f32.mrb[5].mxu0  ;;  %v1305_v35 = vmul.f32 %v1757_v21, %v1757_v21  ;;  %v2129_v48 = vpop.f32.mrb[5].mxu1 }
 0x125   :  { %v1429_v24 = vadd.f32 %v1428_v20, %v1302_v18  ;;  %v1168_v25 = vadd.f32 %v1167_v19, %v670_v22  ;;  %v1303_v26 = vmul.f32 %v670_v22, %v670_v22  ;;  %v1758_v27 = vpop.f32.mrb[6].mxu0  ;;  %v2131_v50 = vpop.f32.mrb[6].mxu1 }
 0x126   :  { %v673_v29 = vpop.f32.mrb[7].mxu0  ;;  %v1306_v38 = vmul.f32 %v1758_v27, %v1758_v27  ;;  %v2133_v54 = vpop.f32.mrb[7].mxu1 }
 0x127   :  { %v1430_v31 = vadd.f32 %v1429_v24, %v1303_v26  ;;  %v1169_v32 = vadd.f32 %v1168_v25, %v673_v29  ;;  %v1304_v33 = vmul.f32 %v673_v29, %v673_v29 }
 0x129   :  { %v1170_v36 = vadd.f32 %v1757_v21, %v1169_v32  ;;  %v1431_v37 = vadd.f32 %v1430_v31, %v1304_v33 }
 0x12b   :  { %v1432_v39 = vadd.f32 %v1431_v37, %v1305_v35  ;;  %v1761_v40 = vpop.f32.mrb[8].mxu0  ;;  %v1171_v41 = vadd.f32 %v1758_v27, %v1170_v36  ;;  %v2135_v63 = vpop.f32.mrb[8].mxu1 }
 0x12c   :  { %v686_v42 = vpop.f32.mrb[9].mxu0  ;;  %v1309_v55 = vmul.f32 %v1761_v40, %v1761_v40  ;;  %v2137_v4 = vpop.f32.mrb[9].mxu1 }
 0x12d   :  { %v1172_v44 = vadd.f32 %v1171_v41, %v686_v42  ;;  %v1307_v45 = vmul.f32 %v686_v42, %v686_v42  ;;  %v1433_v46 = vadd.f32 %v1432_v39, %v1306_v38  ;;  %v1762_v47 = vpop.f32.mrb[10].mxu0  ;;  %v2139_v6 = vpop.f32.mrb[10].mxu1 }
 0x12e   :  { %v689_v49 = vpop.f32.mrb[11].mxu0  ;;  %v1310_v58 = vmul.f32 %v1762_v47, %v1762_v47  ;;  %v2141_v10 = vpop.f32.mrb[11].mxu1 }
 0x12f   :  { %v1434_v51 = vadd.f32 %v1433_v46, %v1307_v45  ;;  %v1173_v52 = vadd.f32 %v1172_v44, %v689_v49  ;;  %v1308_v53 = vmul.f32 %v689_v49, %v689_v49 }
 0x131   :  { %v1174_v56 = vadd.f32 %v1761_v40, %v1173_v52  ;;  %v1435_v57 = vadd.f32 %v1434_v51, %v1308_v53 }
 0x133   :  { %v1436_v59 = vadd.f32 %v1435_v57, %v1309_v55  ;;  %v1765_v60 = vpop.f32.mrb[12].mxu0  ;;  %v1175_v61 = vadd.f32 %v1762_v47, %v1174_v56  ;;  %v2143_v19 = vpop.f32.mrb[12].mxu1 }
 0x134   :  { %v702_v62 = vpop.f32.mrb[13].mxu0  ;;  %v1313_v11 = vmul.f32 %v1765_v60, %v1765_v60  ;;  %v2145_v25 = vpop.f32.mrb[13].mxu1 }
 0x135   :  { %v1176_v0 = vadd.f32 %v1175_v61, %v702_v62  ;;  %v1311_v1 = vmul.f32 %v702_v62, %v702_v62  ;;  %v1437_v2 = vadd.f32 %v1436_v59, %v1310_v58  ;;  %v1766_v3 = vpop.f32.mrb[14].mxu0  ;;  %v2147_v27 = vpop.f32.mrb[14].mxu1 }
 0x136   :  { %v705_v5 = vpop.f32.mrb[15].mxu0  ;;  %v1314_v14 = vmul.f32 %v1766_v3, %v1766_v3  ;;  %v2149_v33 = vpop.f32.mrb[15].mxu1 }
 0x137   :  { %v1438_v7 = vadd.f32 %v1437_v2, %v1311_v1  ;;  %v1177_v8 = vadd.f32 %v1176_v0, %v705_v5  ;;  %v1312_v9 = vmul.f32 %v705_v5, %v705_v5 }
 0x139   :  { %v1178_v12 = vadd.f32 %v1765_v60, %v1177_v8  ;;  %v1439_v13 = vadd.f32 %v1438_v7, %v1312_v9 }
 0x13b   :  { %v1440_v15 = vadd.f32 %v1439_v13, %v1313_v11  ;;  %v1769_v16 = vpop.f32.mrb[16].mxu0  ;;  %v1179_v17 = vadd.f32 %v1766_v3, %v1178_v12  ;;  %v2151_v44 = vpop.f32.mrb[16].mxu1 }
 0x13c   :  { %v718_v18 = vpop.f32.mrb[17].mxu0  ;;  %v1317_v35 = vmul.f32 %v1769_v16, %v1769_v16  ;;  %v2153_v51 = vpop.f32.mrb[17].mxu1 }
 0x13d   :  { %v1180_v20 = vadd.f32 %v1179_v17, %v718_v18  ;;  %v1315_v21 = vmul.f32 %v718_v18, %v718_v18  ;;  %v1441_v22 = vadd.f32 %v1440_v15, %v1314_v14  ;;  %v1770_v24 = vpop.f32.mrb[18].mxu0  ;;  %v2155_v53 = vpop.f32.mrb[18].mxu1 }
 0x13e   :  { %v721_v26 = vpop.f32.mrb[19].mxu0  ;;  %v1318_v38 = vmul.f32 %v1770_v24, %v1770_v24  ;;  %v2157_v58 = vpop.f32.mrb[19].mxu1 }
 0x13f   :  { %v1442_v29 = vadd.f32 %v1441_v22, %v1315_v21  ;;  %v1181_v31 = vadd.f32 %v1180_v20, %v721_v26  ;;  %v1316_v32 = vmul.f32 %v721_v26, %v721_v26 }
 0x141   :  { %v1182_v36 = vadd.f32 %v1769_v16, %v1181_v31  ;;  %v1443_v37 = vadd.f32 %v1442_v29, %v1316_v32 }
 0x143   :  { %v1444_v39 = vadd.f32 %v1443_v37, %v1317_v35  ;;  %v1773_v40 = vpop.f32.mrb[20].mxu0  ;;  %v1183_v41 = vadd.f32 %v1770_v24, %v1182_v36  ;;  %v2159_v5 = vpop.f32.mrb[20].mxu1 }
 0x144   :  { %v734_v42 = vpop.f32.mrb[21].mxu0  ;;  %v1321_v59 = vmul.f32 %v1773_v40, %v1773_v40  ;;  %v2161_v12 = vpop.f32.mrb[21].mxu1 }
 0x145   :  { %v1184_v45 = vadd.f32 %v1183_v41, %v734_v42  ;;  %v1319_v46 = vmul.f32 %v734_v42, %v734_v42  ;;  %v1445_v47 = vadd.f32 %v1444_v39, %v1318_v38  ;;  %v1774_v49 = vpop.f32.mrb[22].mxu0  ;;  %v2163_v14 = vpop.f32.mrb[22].mxu1 }
 0x146   :  { %v737_v52 = vpop.f32.mrb[23].mxu0  ;;  %v1322_v62 = vmul.f32 %v1774_v49, %v1774_v49  ;;  %v2165_v18 = vpop.f32.mrb[23].mxu1 }
 0x147   :  { %v1446_v55 = vadd.f32 %v1445_v47, %v1319_v46  ;;  %v1185_v56 = vadd.f32 %v1184_v45, %v737_v52  ;;  %v1320_v57 = vmul.f32 %v737_v52, %v737_v52 }
 0x149   :  { %v1186_v60 = vadd.f32 %v1773_v40, %v1185_v56  ;;  %v1447_v61 = vadd.f32 %v1446_v55, %v1320_v57 }
 0x14b   :  { %v1448_v0 = vadd.f32 %v1447_v61, %v1321_v59  ;;  %v1777_v1 = vpop.f32.mrb[24].mxu0  ;;  %v1187_v2 = vadd.f32 %v1774_v49, %v1186_v60  ;;  %v2167_v35 = vpop.f32.mrb[24].mxu1 }
 0x14c   :  { %v750_v3 = vpop.f32.mrb[25].mxu0  ;;  %v1325_v20 = vmul.f32 %v1777_v1, %v1777_v1  ;;  %v2169_v40 = vpop.f32.mrb[25].mxu1 }
 0x14d   :  { %v1188_v7 = vadd.f32 %v1187_v2, %v750_v3  ;;  %v1323_v8 = vmul.f32 %v750_v3, %v750_v3  ;;  %v1449_v9 = vadd.f32 %v1448_v0, %v1322_v62  ;;  %v1778_v11 = vpop.f32.mrb[26].mxu0  ;;  %v2171_v42 = vpop.f32.mrb[26].mxu1 }
 0x14e   :  { %v753_v13 = vpop.f32.mrb[27].mxu0  ;;  %v1326_v24 = vmul.f32 %v1778_v11, %v1778_v11  ;;  %v2173_v49 = vpop.f32.mrb[27].mxu1 }
 0x14f   :  { %v1450_v15 = vadd.f32 %v1449_v9, %v1323_v8  ;;  %v1189_v16 = vadd.f32 %v1188_v7, %v753_v13  ;;  %v1324_v17 = vmul.f32 %v753_v13, %v753_v13 }
 0x151   :  { %v1190_v21 = vadd.f32 %v1777_v1, %v1189_v16  ;;  %v1451_v22 = vadd.f32 %v1450_v15, %v1324_v17 }
 0x153   :  { %v1452_v26 = vadd.f32 %v1451_v22, %v1325_v20  ;;  %v1781_v29 = vpop.f32.mrb[28].mxu0  ;;  %v1191_v31 = vadd.f32 %v1778_v11, %v1190_v21  ;;  %v2175_v0 = vpop.f32.mrb[28].mxu1 }
 0x154   :  { %v766_v32 = vpop.f32.mrb[29].mxu0  ;;  %v1329_v52 = vmul.f32 %v1781_v29, %v1781_v29  ;;  %v2177_v8 = vpop.f32.mrb[29].mxu1 }
 0x155   :  { %v1192_v36 = vadd.f32 %v1191_v31, %v766_v32  ;;  %v1327_v37 = vmul.f32 %v766_v32, %v766_v32  ;;  %v1453_v38 = vadd.f32 %v1452_v26, %v1326_v24  ;;  %v1782_v39 = vpop.f32.mrb[30].mxu0  ;;  %v2179_v11 = vpop.f32.mrb[30].mxu1 }
 0x156   :  { %v769_v41 = vpop.f32.mrb[31].mxu0  ;;  %v1330_v57 = vmul.f32 %v1782_v39, %v1782_v39  ;;  %v2181_v17 = vpop.f32.mrb[31].mxu1 }
 0x157   :  { %v1454_v45 = vadd.f32 %v1453_v38, %v1327_v37  ;;  %v1193_v46 = vadd.f32 %v1192_v36, %v769_v41  ;;  %v1328_v47 = vmul.f32 %v769_v41, %v769_v41 }
 0x159   :  { %v1194_v55 = vadd.f32 %v1781_v29, %v1193_v46  ;;  %v1455_v56 = vadd.f32 %v1454_v45, %v1328_v47 }
 0x15b   :  { %v1456_v59 = vadd.f32 %v1455_v56, %v1329_v52  ;;  %v1785_v60 = vpop.f32.mrb[32].mxu0  ;;  %v1195_v61 = vadd.f32 %v1782_v39, %v1194_v55  ;;  %v2183_v36 = vpop.f32.mrb[32].mxu1 }
 0x15c   :  { %v782_v62 = vpop.f32.mrb[33].mxu0  ;;  %v1333_v20 = vmul.f32 %v1785_v60, %v1785_v60  ;;  %v2185_v45 = vpop.f32.mrb[33].mxu1 }
 0x15d   :  { %v1196_v1 = vadd.f32 %v1195_v61, %v782_v62  ;;  %v1331_v2 = vmul.f32 %v782_v62, %v782_v62  ;;  %v1457_v3 = vadd.f32 %v1456_v59, %v1330_v57  ;;  %v1786_v7 = vpop.f32.mrb[34].mxu0  ;;  %v2187_v47 = vpop.f32.mrb[34].mxu1 }
 0x15e   :  { %v785_v9 = vpop.f32.mrb[35].mxu0  ;;  %v1334_v24 = vmul.f32 %v1786_v7, %v1786_v7  ;;  %v2189_v57 = vpop.f32.mrb[35].mxu1 }
 0x15f   :  { %v1458_v13 = vadd.f32 %v1457_v3, %v1331_v2  ;;  %v1197_v15 = vadd.f32 %v1196_v1, %v785_v9  ;;  %v1332_v16 = vmul.f32 %v785_v9, %v785_v9 }
 0x161   :  { %v1198_v21 = vadd.f32 %v1785_v60, %v1197_v15  ;;  %v1459_v22 = vadd.f32 %v1458_v13, %v1332_v16 }
 0x163   :  { %v1460_v26 = vadd.f32 %v1459_v22, %v1333_v20  ;;  %v1789_v29 = vpop.f32.mrb[36].mxu0  ;;  %v1199_v31 = vadd.f32 %v1786_v7, %v1198_v21  ;;  %v2191_v9 = vpop.f32.mrb[36].mxu1 }
 0x164   :  { %v798_v32 = vpop.f32.mrb[37].mxu0  ;;  %v1337_v59 = vmul.f32 %v1789_v29, %v1789_v29  ;;  %v2193_v21 = vpop.f32.mrb[37].mxu1 }
 0x165   :  { %v1200_v37 = vadd.f32 %v1199_v31, %v798_v32  ;;  %v1335_v38 = vmul.f32 %v798_v32, %v798_v32  ;;  %v1461_v39 = vadd.f32 %v1460_v26, %v1334_v24  ;;  %v1790_v41 = vpop.f32.mrb[38].mxu0  ;;  %v2195_v24 = vpop.f32.mrb[38].mxu1 }
 0x166   :  { %v801_v46 = vpop.f32.mrb[39].mxu0  ;;  %v1338_v62 = vmul.f32 %v1790_v41, %v1790_v41  ;;  %v2197_v32 = vpop.f32.mrb[39].mxu1 }
 0x167   :  { %v1462_v52 = vadd.f32 %v1461_v39, %v1335_v38  ;;  %v1201_v55 = vadd.f32 %v1200_v37, %v801_v46  ;;  %v1336_v56 = vmul.f32 %v801_v46, %v801_v46 }
 0x169   :  { %v1202_v60 = vadd.f32 %v1789_v29, %v1201_v55  ;;  %v1463_v61 = vadd.f32 %v1462_v52, %v1336_v56 }
 0x16b   :  { %v1464_v1 = vadd.f32 %v1463_v61, %v1337_v59  ;;  %v1793_v2 = vpop.f32.mrb[40].mxu0  ;;  %v1203_v3 = vadd.f32 %v1790_v41, %v1202_v60  ;;  %v2199_v59 = vpop.f32.mrb[40].mxu1 }
 0x16c   :  { %v814_v7 = vpop.f32.mrb[41].mxu0  ;;  %v1341_v37 = vmul.f32 %v1793_v2, %v1793_v2  ;;  %2491 = vst [vmem:[#allocation14_spill] sm:$0xff] %v2199_v59 }
 0x16d   :  { %v1204_v13 = vadd.f32 %v1203_v3, %v814_v7  ;;  %v1339_v15 = vmul.f32 %v814_v7, %v814_v7  ;;  %v1465_v16 = vadd.f32 %v1464_v1, %v1338_v62  ;;  %v1794_v20 = vpop.f32.mrb[42].mxu0  ;;  %v2201_v3 = vpop.f32.mrb[41].mxu1 }
 0x16e   :  { %v817_v22 = vpop.f32.mrb[43].mxu0  ;;  %v1342_v41 = vmul.f32 %v1794_v20, %v1794_v20  ;;  %2492 = vst [vmem:[#allocation15_spill] sm:$0xff] %v2201_v3 }
 0x16f   :  { %v1466_v26 = vadd.f32 %v1465_v16, %v1339_v15  ;;  %v1205_v31 = vadd.f32 %v1204_v13, %v817_v22  ;;  %v1340_v29 = vmul.f32 %v817_v22, %v817_v22  ;;  %v2203_v13 = vpop.f32.mrb[42].mxu1 }
 0x170   :  { %2493 = vst [vmem:[#allocation16_spill] sm:$0xff] %v2203_v13  ;;  %v2205_v22 = vpop.f32.mrb[43].mxu1 }
 0x171   :  { %v1206_v38 = vadd.f32 %v1793_v2, %v1205_v31  ;;  %v1467_v39 = vadd.f32 %v1466_v26, %v1340_v29  ;;  %2494 = vst [vmem:[#allocation17_spill] sm:$0xff] %v2205_v22 }
 0x173   :  { %v1468_v46 = vadd.f32 %v1467_v39, %v1341_v37  ;;  %v1797_v52 = vpop.f32.mrb[44].mxu0  ;;  %v1207_v55 = vadd.f32 %v1794_v20, %v1206_v38 }
 0x174   :  { %v830_v56 = vpop.f32.mrb[45].mxu0  ;;  %v1345_v26 = vmul.f32 %v1797_v52, %v1797_v52 }
 0x175   :  { %v1208_v60 = vadd.f32 %v1207_v55, %v830_v56  ;;  %v1343_v61 = vmul.f32 %v830_v56, %v830_v56  ;;  %v1469_v62 = vadd.f32 %v1468_v46, %v1342_v41  ;;  %v1798_v1 = vpop.f32.mrb[46].mxu0  ;;  %v2207_v41 = vpop.f32.mrb[44].mxu1 }
 0x176   :  { %v833_v7 = vpop.f32.mrb[47].mxu0  ;;  %v1346_v29 = vmul.f32 %v1798_v1, %v1798_v1  ;;  %2495 = vst [vmem:[#allocation18_spill] sm:$0xff] %v2207_v41  ;;  %v2209_v13 = vpop.f32.mrb[45].mxu1 }
 0x177   :  { %v1470_v15 = vadd.f32 %v1469_v62, %v1343_v61  ;;  %v1209_v16 = vadd.f32 %v1208_v60, %v833_v7  ;;  %v1344_v2 = vmul.f32 %v833_v7, %v833_v7  ;;  %2496 = vst [vmem:[#allocation19_spill] sm:$0xff] %v2209_v13  ;;  %v2211_v61 = vpop.f32.mrb[46].mxu1 }
 0x178   :  { %2497 = vst [vmem:[#allocation20_spill] sm:$0xff] %v2211_v61 }
 0x179   :  { %v1210_v31 = vadd.f32 %v1797_v52, %v1209_v16  ;;  %v1471_v20 = vadd.f32 %v1470_v15, %v1344_v2  ;;  %v2213_v15 = vpop.f32.mrb[47].mxu1 }
 0x17a   :  { %2498 = vst [vmem:[#allocation21_spill] sm:$0xff] %v2213_v15 }
 0x17b   :  { %v1472_v37 = vadd.f32 %v1471_v20, %v1345_v26  ;;  %v1801_v38 = vpop.f32.mrb[48].mxu0  ;;  %v1211_v39 = vadd.f32 %v1798_v1, %v1210_v31 }
 0x17c   :  { %v846_v55 = vpop.f32.mrb[49].mxu0  ;;  %v1349_v16 = vmul.f32 %v1801_v38, %v1801_v38 }
 0x17d   :  { %v1212_v46 = vadd.f32 %v1211_v39, %v846_v55  ;;  %v1347_v56 = vmul.f32 %v846_v55, %v846_v55  ;;  %v1473_v59 = vadd.f32 %v1472_v37, %v1346_v29  ;;  %v1802_v3 = vpop.f32.mrb[50].mxu0  ;;  %v2215_v29 = vpop.f32.mrb[48].mxu1 }
 0x17e   :  { %v849_v60 = vpop.f32.mrb[51].mxu0  ;;  %v1350_v26 = vmul.f32 %v1802_v3, %v1802_v3  ;;  %2499 = vst [vmem:[#allocation22_spill] sm:$0xff] %v2215_v29  ;;  %v2217_v61 = vpop.f32.mrb[49].mxu1 }
 0x17f   :  { %v1474_v62 = vadd.f32 %v1473_v59, %v1347_v56  ;;  %v1213_v7 = vadd.f32 %v1212_v46, %v849_v60  ;;  %v1348_v52 = vmul.f32 %v849_v60, %v849_v60  ;;  %2500 = vst [vmem:[#allocation23_spill] sm:$0xff] %v2217_v61  ;;  %v2219_v46 = vpop.f32.mrb[50].mxu1 }
 0x180   :  { %2501 = vst [vmem:[#allocation24_spill] sm:$0xff] %v2219_v46 }
 0x181   :  { %v1214_v2 = vadd.f32 %v1801_v38, %v1213_v7  ;;  %v1475_v1 = vadd.f32 %v1474_v62, %v1348_v52  ;;  %v2221_v62 = vpop.f32.mrb[51].mxu1 }
 0x182   :  { %2502 = vst [vmem:[#allocation25_spill] sm:$0xff] %v2221_v62 }
 0x183   :  { %v1476_v31 = vadd.f32 %v1475_v1, %v1349_v16  ;;  %v1805_v20 = vpop.f32.mrb[52].mxu0  ;;  %v1215_v39 = vadd.f32 %v1802_v3, %v1214_v2 }
 0x184   :  { %v862_v55 = vpop.f32.mrb[53].mxu0  ;;  %v1353_v7 = vmul.f32 %v1805_v20, %v1805_v20 }
 0x185   :  { %v1216_v37 = vadd.f32 %v1215_v39, %v862_v55  ;;  %v1351_v41 = vmul.f32 %v862_v55, %v862_v55  ;;  %v1477_v13 = vadd.f32 %v1476_v31, %v1350_v26  ;;  %v1806_v22 = vpop.f32.mrb[54].mxu0  ;;  %v2223_v26 = vpop.f32.mrb[52].mxu1 }
 0x186   :  { %v865_v59 = vpop.f32.mrb[55].mxu0  ;;  %v1354_v16 = vmul.f32 %v1806_v22, %v1806_v22  ;;  %2503 = vst [vmem:[#allocation26_spill] sm:$0xff] %v2223_v26  ;;  %v2225_v46 = vpop.f32.mrb[53].mxu1 }
 0x187   :  { %v1478_v56 = vadd.f32 %v1477_v13, %v1351_v41  ;;  %v1217_v60 = vadd.f32 %v1216_v37, %v865_v59  ;;  %v1352_v38 = vmul.f32 %v865_v59, %v865_v59  ;;  %2504 = vst [vmem:[#allocation27_spill] sm:$0xff] %v2225_v46  ;;  %v2227_v41 = vpop.f32.mrb[54].mxu1 }
 0x188   :  { %2505 = vst [vmem:[#allocation28_spill] sm:$0xff] %v2227_v41 }
 0x189   :  { %v1218_v52 = vadd.f32 %v1805_v20, %v1217_v60  ;;  %v1479_v3 = vadd.f32 %v1478_v56, %v1352_v38  ;;  %v2229_v56 = vpop.f32.mrb[55].mxu1 }
 0x18b   :  { %v1480_v2 = vadd.f32 %v1479_v3, %v1353_v7  ;;  %v1809_v1 = vpop.f32.mrb[56].mxu0  ;;  %v1219_v39 = vadd.f32 %v1806_v22, %v1218_v52 }
 0x18c   :  { %v878_v55 = vpop.f32.mrb[57].mxu0  ;;  %v1357_v60 = vmul.f32 %v1809_v1, %v1809_v1 }
 0x18d   :  { %v1220_v31 = vadd.f32 %v1219_v39, %v878_v55  ;;  %v1355_v29 = vmul.f32 %v878_v55, %v878_v55  ;;  %v1481_v61 = vadd.f32 %v1480_v2, %v1354_v16  ;;  %v1810_v15 = vpop.f32.mrb[58].mxu0  ;;  %v2231_v16 = vpop.f32.mrb[56].mxu1 }
 0x18e   :  { %v881_v13 = vpop.f32.mrb[59].mxu0  ;;  %v1358_v7 = vmul.f32 %v1810_v15, %v1810_v15  ;;  %v2233_v41 = vpop.f32.mrb[57].mxu1 }
 0x18f   :  { %v1482_v37 = vadd.f32 %v1481_v61, %v1355_v29  ;;  %v1221_v59 = vadd.f32 %v1220_v31, %v881_v13  ;;  %v1356_v20 = vmul.f32 %v881_v13, %v881_v13  ;;  %v2235_v29 = vpop.f32.mrb[58].mxu1 }
 0x190   :  { %2506 = vst [vmem:[#allocation29_spill] sm:$0xff] %v2235_v29 }
 0x191   :  { %v1222_v38 = vadd.f32 %v1809_v1, %v1221_v59  ;;  %v1483_v22 = vadd.f32 %v1482_v37, %v1356_v20  ;;  %v2237_v37 = vpop.f32.mrb[59].mxu1 }
 0x193   :  { %v1484_v52 = vadd.f32 %v1483_v22, %v1357_v60  ;;  %v1813_v3 = vpop.f32.mrb[60].mxu0  ;;  %v1223_v39 = vadd.f32 %v1810_v15, %v1222_v38 }
 0x194   :  { %v894_v55 = vpop.f32.mrb[61].mxu0  ;;  %v1361_v59 = vmul.f32 %v1813_v3, %v1813_v3 }
 0x195   :  { %v1224_v2 = vadd.f32 %v1223_v39, %v894_v55  ;;  %v1359_v26 = vmul.f32 %v894_v55, %v894_v55  ;;  %v1485_v46 = vadd.f32 %v1484_v52, %v1358_v7  ;;  %v1814_v62 = vpop.f32.mrb[62].mxu0  ;;  %v1363_v7 = vmul.f32 %v2121_v28, %v2121_v28  ;;  %v2241_v52 = vpop.f32.mrb[60].mxu1 }
 0x196   :  { %v897_v61 = vpop.f32.mrb[63].mxu0  ;;  %v1362_v60 = vmul.f32 %v1814_v62, %v1814_v62  ;;  %v2244_v29 = vpop.f32.mrb[61].mxu1 }
 0x197   :  { %v1486_v31 = vadd.f32 %v1485_v46, %v1359_v26  ;;  %v1225_v13 = vadd.f32 %v1224_v2, %v897_v61  ;;  %v1360_v1 = vmul.f32 %v897_v61, %v897_v61  ;;  %v2246_v46 = vpop.f32.mrb[62].mxu1  ;;  %v1365_v61 = vmul.f32 %v2119_v23, %v2119_v23 }
 0x199   :  { %v1226_v20 = vadd.f32 %v1813_v3, %v1225_v13  ;;  %v1487_v15 = vadd.f32 %v1486_v31, %v1360_v1  ;;  %v1364_v3 = vmul.f32 %v2125_v34, %v2125_v34 }
 0x19b   :  { %v1227_v38 = vadd.f32 %v1814_v62, %v1226_v20  ;;  %v1488_v22 = vadd.f32 %v1487_v15, %v1361_v59  ;;  %v2251_v62 = vpop.f32.mrb[63].mxu1  ;;  %v1367_v20 = vmul.f32 %v2129_v48, %v2129_v48 }
 0x19d   :  { %v1489_v39 = vadd.f32 %v1488_v22, %v1362_v60  ;;  %v1228_v55 = vadd.f32 %v1227_v38, %v2121_v28  ;;  %v1366_v28 = vmul.f32 %v2123_v30, %v2123_v30  ;;  %v1368_v22 = vmul.f32 %v2133_v54, %v2133_v54 }
 0x19f   :  { %v1490_v26 = vadd.f32 %v1489_v39, %v1363_v7  ;;  %v1229_v2 = vadd.f32 %v1228_v55, %v2125_v34 }
 0x1a1   :  { %v1230_v31 = vadd.f32 %v2119_v23, %v1229_v2  ;;  %v1491_v13 = vadd.f32 %v1490_v26, %v1364_v3  ;;  %v1369_v23 = vmul.f32 %v2127_v43, %v2127_v43 }
 0x1a3   :  { %v1492_v1 = vadd.f32 %v1491_v13, %v1365_v61  ;;  %v1231_v59 = vadd.f32 %v2123_v30, %v1230_v31  ;;  %v1370_v30 = vmul.f32 %v2131_v50, %v2131_v50  ;;  %v1372_v31 = vmul.f32 %v2141_v10, %v2141_v10 }
 0x1a5   :  { %v1232_v15 = vadd.f32 %v1231_v59, %v2129_v48  ;;  %v1493_v34 = vadd.f32 %v1492_v1, %v1366_v28  ;;  %v1371_v48 = vmul.f32 %v2137_v4, %v2137_v4 }
 0x1a7   :  { %v1494_v60 = vadd.f32 %v1493_v34, %v1367_v20  ;;  %v1233_v38 = vadd.f32 %v1232_v15, %v2133_v54 }
 0x1a9   :  { %v1234_v7 = vadd.f32 %v2127_v43, %v1233_v38  ;;  %v1495_v39 = vadd.f32 %v1494_v60, %v1368_v22  ;;  %v1373_v43 = vmul.f32 %v2135_v63, %v2135_v63  ;;  %v1376_v60 = vmul.f32 %v2149_v33, %v2149_v33 }
 0x1ab   :  { %v1496_v55 = vadd.f32 %v1495_v39, %v1369_v23  ;;  %v1235_v26 = vadd.f32 %v2131_v50, %v1234_v7  ;;  %v1374_v50 = vmul.f32 %v2139_v6, %v2139_v6 }
 0x1ad   :  { %v1236_v2 = vadd.f32 %v1235_v26, %v2137_v4  ;;  %v1497_v3 = vadd.f32 %v1496_v55, %v1370_v30  ;;  %v1375_v4 = vmul.f32 %v2145_v25, %v2145_v25  ;;  %v1380_v26 = vmul.f32 %v2157_v58, %v2157_v58 }
 0x1af   :  { %v1498_v61 = vadd.f32 %v1497_v3, %v1371_v48  ;;  %v1237_v54 = vadd.f32 %v1236_v2, %v2141_v10 }
 0x1b1   :  { %v1238_v13 = vadd.f32 %v2135_v63, %v1237_v54  ;;  %v1499_v28 = vadd.f32 %v1498_v61, %v1372_v31  ;;  %v1377_v63 = vmul.f32 %v2143_v19, %v2143_v19 }
 0x1b3   :  { %v1500_v1 = vadd.f32 %v1499_v28, %v1373_v43  ;;  %v1239_v59 = vadd.f32 %v2139_v6, %v1238_v13  ;;  %v1378_v6 = vmul.f32 %v2147_v27, %v2147_v27  ;;  %v1384_v13 = vmul.f32 %v2165_v18, %v2165_v18 }
 0x1b5   :  { %v1240_v20 = vadd.f32 %v1239_v59, %v2145_v25  ;;  %v1501_v15 = vadd.f32 %v1500_v1, %v1374_v50  ;;  %v1379_v25 = vmul.f32 %v2153_v51, %v2153_v51 }
 0x1b7   :  { %v1502_v34 = vadd.f32 %v1501_v15, %v1375_v4  ;;  %v1241_v10 = vadd.f32 %v1240_v20, %v2149_v33 }
 0x1b9   :  { %v1242_v38 = vadd.f32 %v2143_v19, %v1241_v10  ;;  %v1503_v22 = vadd.f32 %v1502_v34, %v1376_v60  ;;  %v1381_v19 = vmul.f32 %v2151_v44, %v2151_v44  ;;  %v1388_v34 = vmul.f32 %v2173_v49, %v2173_v49 }
 0x1bb   :  { %v1504_v23 = vadd.f32 %v1503_v22, %v1377_v63  ;;  %v1243_v7 = vadd.f32 %v2147_v27, %v1242_v38  ;;  %v1382_v27 = vmul.f32 %v2155_v53, %v2155_v53 }
 0x1bd   :  { %v1244_v39 = vadd.f32 %v1243_v7, %v2153_v51  ;;  %v1505_v30 = vadd.f32 %v1504_v23, %v1378_v6  ;;  %v1383_v51 = vmul.f32 %v2161_v12, %v2161_v12  ;;  %v1392_v7 = vmul.f32 %v2181_v17, %v2181_v17 }
 0x1bf   :  { %v1506_v55 = vadd.f32 %v1505_v30, %v1379_v25  ;;  %v1245_v33 = vadd.f32 %v1244_v39, %v2157_v58 }
 0x1c1   :  { %v1246_v48 = vadd.f32 %v2151_v44, %v1245_v33  ;;  %v1507_v2 = vadd.f32 %v1506_v55, %v1380_v26  ;;  %v1385_v44 = vmul.f32 %v2159_v5, %v2159_v5 }
 0x1c3   :  { %v1508_v3 = vadd.f32 %v1507_v2, %v1381_v19  ;;  %v1247_v61 = vadd.f32 %v2155_v53, %v1246_v48  ;;  %v1386_v53 = vmul.f32 %v2163_v14, %v2163_v14  ;;  %v1396_v48 = vmul.f32 %v2189_v57, %v2189_v57 }
 0x1c5   :  { %v1248_v54 = vadd.f32 %v1247_v61, %v2161_v12  ;;  %v1509_v31 = vadd.f32 %v1508_v3, %v1382_v27  ;;  %v1387_v12 = vmul.f32 %v2169_v40, %v2169_v40 }
 0x1c7   :  { %v1510_v43 = vadd.f32 %v1509_v31, %v1383_v51  ;;  %v1249_v58 = vadd.f32 %v1248_v54, %v2165_v18 }
 0x1c9   :  { %v1250_v28 = vadd.f32 %v2159_v5, %v1249_v58  ;;  %v1511_v50 = vadd.f32 %v1510_v43, %v1384_v13  ;;  %v1389_v5 = vmul.f32 %v2167_v35, %v2167_v35  ;;  %v1400_v43 = vmul.f32 %v2197_v32, %v2197_v32 }
 0x1cb   :  { %v1512_v1 = vadd.f32 %v1511_v50, %v1385_v44  ;;  %v1251_v59 = vadd.f32 %v2163_v14, %v1250_v28  ;;  %v1390_v14 = vmul.f32 %v2171_v42, %v2171_v42 }
 0x1cd   :  { %v1252_v4 = vadd.f32 %v1251_v59, %v2169_v40  ;;  %v1513_v20 = vadd.f32 %v1512_v1, %v1386_v53  ;;  %v1391_v40 = vmul.f32 %v2177_v8, %v2177_v8 }
 0x1cf   :  { %v1514_v15 = vadd.f32 %v1513_v20, %v1387_v12  ;;  %v1253_v18 = vadd.f32 %v1252_v4, %v2173_v49 }
 0x1d1   :  { %v1254_v10 = vadd.f32 %v2167_v35, %v1253_v18  ;;  %v1515_v60 = vadd.f32 %v1514_v15, %v1388_v34  ;;  %v1393_v35 = vmul.f32 %v2175_v0, %v2175_v0  ;;  %v2510_v34 = vld [vmem:[#allocation16_spill] sm:$0xff] }
 0x1d3   :  { %v1516_v63 = vadd.f32 %v1515_v60, %v1389_v5  ;;  %v1255_v38 = vadd.f32 %v2171_v42, %v1254_v10  ;;  %v1394_v42 = vmul.f32 %v2179_v11, %v2179_v11  ;;  %v2511_v60 = vld [vmem:[#allocation19_spill] sm:$0xff] }
 0x1d5   :  { %v1256_v22 = vadd.f32 %v1255_v38, %v2177_v8  ;;  %v1517_v6 = vadd.f32 %v1516_v63, %v1390_v14  ;;  %v1395_v8 = vmul.f32 %v2185_v45, %v2185_v45  ;;  %v1407_v14 = vmul.f32 %v2511_v60, %v2511_v60 }
 0x1d7   :  { %v1518_v23 = vadd.f32 %v1517_v6, %v1391_v40  ;;  %v1257_v49 = vadd.f32 %v1256_v22, %v2181_v17  ;;  %v2512_v22 = vld [vmem:[#allocation21_spill] sm:$0xff] }
 0x1d9   :  { %v1258_v25 = vadd.f32 %v2175_v0, %v1257_v49  ;;  %v1519_v39 = vadd.f32 %v1518_v23, %v1392_v7  ;;  %v1397_v0 = vmul.f32 %v2183_v36, %v2183_v36  ;;  %v1408_v23 = vmul.f32 %v2512_v22, %v2512_v22  ;;  %v2513_v49 = vld [vmem:[#allocation18_spill] sm:$0xff] }
 0x1da   :  { %v1409_v7 = vmul.f32 %v2513_v49, %v2513_v49 }
 0x1db   :  { %v1520_v30 = vadd.f32 %v1519_v39, %v1393_v35  ;;  %v1259_v55 = vadd.f32 %v2179_v11, %v1258_v25  ;;  %v1398_v11 = vmul.f32 %v2187_v47, %v2187_v47  ;;  %v2514_v39 = vld [vmem:[#allocation20_spill] sm:$0xff] }
 0x1dd   :  { %v1260_v33 = vadd.f32 %v1259_v55, %v2185_v45  ;;  %v1521_v26 = vadd.f32 %v1520_v30, %v1394_v42  ;;  %v1399_v45 = vmul.f32 %v2193_v21, %v2193_v21  ;;  %v1410_v42 = vmul.f32 %v2514_v39, %v2514_v39 }
 0x1df   :  { %v1522_v19 = vadd.f32 %v1521_v26, %v1395_v8  ;;  %v1261_v17 = vadd.f32 %v1260_v33, %v2189_v57  ;;  %v2515_v8 = vld [vmem:[#allocation23_spill] sm:$0xff] }
 0x1e0   :  { %v1411_v33 = vmul.f32 %v2515_v8, %v2515_v8 }
 0x1e1   :  { %v1262_v2 = vadd.f32 %v2183_v36, %v1261_v17  ;;  %v1523_v27 = vadd.f32 %v1522_v19, %v1396_v48  ;;  %v1401_v36 = vmul.f32 %v2191_v9, %v2191_v9  ;;  %v2516_v48 = vld [vmem:[#allocation25_spill] sm:$0xff] }
 0x1e3   :  { %v1524_v3 = vadd.f32 %v1523_v27, %v1397_v0  ;;  %v1263_v61 = vadd.f32 %v2187_v47, %v1262_v2  ;;  %v1402_v47 = vmul.f32 %v2195_v24, %v2195_v24  ;;  %v1412_v2 = vmul.f32 %v2516_v48, %v2516_v48  ;;  %v2517_v27 = vld [vmem:[#allocation22_spill] sm:$0xff] }
 0x1e5   :  { %v1264_v51 = vadd.f32 %v1263_v61, %v2193_v21  ;;  %v1525_v54 = vadd.f32 %v1524_v3, %v1398_v11  ;;  %v2507_v21 = vld [vmem:[#allocation15_spill] sm:$0xff]  ;;  %v1413_v11 = vmul.f32 %v2517_v27, %v2517_v27 }
 0x1e6   :  { %v1403_v50 = vmul.f32 %v2507_v21, %v2507_v21 }
 0x1e7   :  { %v1526_v31 = vadd.f32 %v1525_v54, %v1399_v45  ;;  %v1265_v57 = vadd.f32 %v1264_v51, %v2197_v32  ;;  %v2508_v32 = vld [vmem:[#allocation17_spill] sm:$0xff]  ;;  %v2518_v45 = vld [vmem:[#allocation24_spill] sm:$0xff] }
 0x1e8   :  { %v1404_v4 = vmul.f32 %v2508_v32, %v2508_v32  ;;  %v1414_v51 = vmul.f32 %v2518_v45, %v2518_v45 }
 0x1e9   :  { %v1266_v58 = vadd.f32 %v2191_v9, %v1265_v57  ;;  %v1527_v13 = vadd.f32 %v1526_v31, %v1400_v43  ;;  %v2509_v9 = vld [vmem:[#allocation14_spill] sm:$0xff]  ;;  %v2519_v57 = vld [vmem:[#allocation27_spill] sm:$0xff] }
 0x1ea   :  { %v1405_v20 = vmul.f32 %v2509_v9, %v2509_v9  ;;  %v1415_v43 = vmul.f32 %v2519_v57, %v2519_v57 }
 0x1eb   :  { %v1528_v44 = vadd.f32 %v1527_v13, %v1401_v36  ;;  %v1267_v28 = vadd.f32 %v2195_v24, %v1266_v58  ;;  %v1406_v24 = vmul.f32 %v2510_v34, %v2510_v34 }
 0x1ed   :  { %v1268_v53 = vadd.f32 %v1267_v28, %v2507_v21  ;;  %v1529_v1 = vadd.f32 %v1528_v44, %v1402_v47  ;;  %v1416_v44 = vmul.f32 %v2229_v56, %v2229_v56  ;;  %v2520_v28 = vld [vmem:[#allocation26_spill] sm:$0xff] }
 0x1ee   :  { %v1417_v21 = vmul.f32 %v2520_v28, %v2520_v28 }
 0x1ef   :  { %v1530_v59 = vadd.f32 %v1529_v1, %v1403_v50  ;;  %v1269_v12 = vadd.f32 %v1268_v53, %v2508_v32  ;;  %v2521_v1 = vld [vmem:[#allocation28_spill] sm:$0xff] }
 0x1f1   :  { %v1270_v15 = vadd.f32 %v2509_v9, %v1269_v12  ;;  %v1531_v18 = vadd.f32 %v1530_v59, %v1404_v4  ;;  %v1418_v59 = vmul.f32 %v2521_v1, %v2521_v1  ;;  %v1419_v4 = vmul.f32 %v2233_v41, %v2233_v41 }
 0x1f3   :  { %v1532_v5 = vadd.f32 %v1531_v18, %v1405_v20  ;;  %v1271_v10 = vadd.f32 %v2510_v34, %v1270_v15  ;;  %v1420_v18 = vmul.f32 %v2237_v37, %v2237_v37  ;;  %v1421_v34 = vmul.f32 %v2231_v16, %v2231_v16 }
 0x1f5   :  { %v1272_v63 = vadd.f32 %v1271_v10, %v2511_v60  ;;  %v1533_v38 = vadd.f32 %v1532_v5, %v1406_v24  ;;  %v2522_v10 = vld [vmem:[#allocation29_spill] sm:$0xff] }
 0x1f6   :  { %v1422_v60 = vmul.f32 %v2522_v10, %v2522_v10 }
 0x1f7   :  { %v1534_v40 = vadd.f32 %v1533_v38, %v1407_v14  ;;  %v1273_v6 = vadd.f32 %v1272_v63, %v2512_v22 }
 0x1f9   :  { %v1274_v35 = vadd.f32 %v2513_v49, %v1273_v6  ;;  %v1535_v25 = vadd.f32 %v1534_v40, %v1408_v23  ;;  %v1424_v6 = vmul.f32 %v2251_v62, %v2251_v62 }
 0x1fb   :  { %v1536_v30 = vadd.f32 %v1535_v25, %v1409_v7  ;;  %v1275_v55 = vadd.f32 %v2514_v39, %v1274_v35  ;;  %v1426_v7 = vmul.f32 %v2246_v46, %v2246_v46 }
 0x1fd   :  { %v1276_v26 = vadd.f32 %v1275_v55, %v2515_v8  ;;  %v1537_v19 = vadd.f32 %v1536_v30, %v1410_v42 }
 0x1ff   :  { %v1538_v17 = vadd.f32 %v1537_v19, %v1411_v33  ;;  %v1277_v0 = vadd.f32 %v1276_v26, %v2516_v48 }
 0x201   :  { %v1278_v3 = vadd.f32 %v2517_v27, %v1277_v0  ;;  %v1539_v61 = vadd.f32 %v1538_v17, %v1412_v2 }
 0x203   :  { %v1540_v54 = vadd.f32 %v1539_v61, %v1413_v11  ;;  %v1279_v31 = vadd.f32 %v2518_v45, %v1278_v3 }
 0x205   :  { %v1280_v36 = vadd.f32 %v1279_v31, %v2519_v57  ;;  %v1541_v58 = vadd.f32 %v1540_v54, %v1414_v51 }
 0x207   :  { %v1542_v13 = vadd.f32 %v1541_v58, %v1415_v43  ;;  %v1281_v47 = vadd.f32 %v1280_v36, %v2229_v56 }
 0x209   :  { %v1282_v50 = vadd.f32 %v2520_v28, %v1281_v47  ;;  %v1543_v53 = vadd.f32 %v1542_v13, %v1416_v44 }
 0x20b   :  { %v1544_v32 = vadd.f32 %v1543_v53, %v1417_v21  ;;  %v1283_v12 = vadd.f32 %v2521_v1, %v1282_v50 }
 0x20d   :  { %v1284_v9 = vadd.f32 %v1283_v12, %v2233_v41  ;;  %v1545_v20 = vadd.f32 %v1544_v32, %v1418_v59  ;;  %v1423_v41 = vmul.f32 %v2244_v29, %v2244_v29 }
 0x20f   :  { %v1546_v15 = vadd.f32 %v1545_v20, %v1419_v4  ;;  %v1285_v56 = vadd.f32 %v1284_v9, %v2237_v37 }
 0x211   :  { %v1286_v24 = vadd.f32 %v2231_v16, %v1285_v56  ;;  %v1547_v5 = vadd.f32 %v1546_v15, %v1420_v18  ;;  %v1425_v16 = vmul.f32 %v2241_v52, %v2241_v52 }
 0x213   :  { %v1548_v14 = vadd.f32 %v1547_v5, %v1421_v34  ;;  %v1287_v63 = vadd.f32 %v2522_v10, %v1286_v24 }
 0x215   :  { %v1288_v38 = vadd.f32 %v1287_v63, %v2244_v29  ;;  %v1549_v40 = vadd.f32 %v1548_v14, %v1422_v60 }
 0x217   :  { %v1550_v22 = vadd.f32 %v1549_v40, %v1423_v41  ;;  %v1289_v37 = vadd.f32 %v1288_v38, %v2251_v62 }
 0x219   :  { %v1290_v23 = vadd.f32 %v2241_v52, %v1289_v37  ;;  %v1551_v49 = vadd.f32 %v1550_v22, %v1424_v6 }
 0x21b   :  { %v1291_v35 = vadd.f32 %v2246_v46, %v1290_v23  ;;  %v1552_v25 = vadd.f32 %v1551_v49, %v1425_v16 }
 0x21d   :  { %v1292_v29 = vrot.slane %v1291_v35, 4  ;;  %v1553_v39 = vadd.f32 %v1552_v25, %v1426_v7 }
 0x21f   :  { %v1293_v42 = vadd.f32 %v1292_v29, %v1291_v35  ;;  %v1554_v30 = vrot.slane %v1553_v39, 4 }
 0x221   :  { %v1294_v55 = vrot.slane %v1293_v42, 2  ;;  %v1555_v8 = vadd.f32 %v1554_v30, %v1553_v39 }
 0x223   :  { %v1295_v33 = vadd.f32 %v1294_v55, %v1293_v42  ;;  %v1556_v62 = vrot.slane %v1555_v8, 2 }
 0x225   :  { %v1296_v26 = vrot.slane %v1295_v33, 1  ;;  %v1557_v19 = vadd.f32 %v1556_v62, %v1555_v8 }
 0x227   :  { %v1297_v52 = vadd.f32 %v1296_v26, %v1295_v33  ;;  %v1558_v17 = vrot.slane %v1557_v19, 1 }
 0x229   :  { %1298 = vst [vmem:[#allocation7] sm:$0x1] %v1297_v52  ;;  %v1559_v46 = vadd.f32 %v1558_v17, %v1557_v19 }
 0x22a   :  { %2028 = shalt.err (!%p2025_p6)
}
 0x22b   :  { %s2029_s17 = scalar_lea.hbm %s2473_s2, 16 }
 0x22c   :  { %p2030_p7 = scmp.ne.s32.totalorder %s2473_s2, %s2029_s17  ;;  %p2033_p8 = scmp.lt.u32.totalorder %s2029_s17, %s2473_s2 }
 0x22e   :  { %p2035_p9 = pnand %p2033_p8, %p2030_p7 }
 0x230   :  { %2038 = shalt.err (!%p2035_p9)
}
 0x231   :  { %1570 = dma.vmem_to_hbm [thread:$0]  %s1568_s10, 16, %s2473_s2, [#allocation4]   ;;  %1560 = vst [vmem:[#allocation8] sm:$0x1] %v1559_v46 }
 0x232   :  { %s2039_s24 = scalar_lea.vmem %s2439_s12, 16  ;;  %s2043_s25 = scalar_lea.vmem %s2439_s12, 32 }
 0x233   :  { %p2040_p10 = scmp.ne.s32.totalorder %s2439_s12, %s2039_s24  ;;  %p2044_p11 = scmp.lt.s32.totalorder %s2439_s12, %s2439_s12 }
 0x234   :  { %p2045_p12 = scmp.lt.s32.totalorder %s2043_s25, %s2039_s24 }
 0x236   :  { %p2046_p13 = por %p2045_p12, %p2044_p11 }
 0x238   :  { %p2047_p0 = pnand %p2046_p13, %p2040_p10 }
 0x23a   :  { %2050 = shalt.err (!%p2047_p0)
}
 0x23b   :  { %s2051_s28 = scalar_lea.hbm %s2474_s3, 16 }
 0x23c   :  { %p2052_p1 = scmp.ne.s32.totalorder %s2474_s3, %s2051_s28  ;;  %p2055_p2 = scmp.lt.u32.totalorder %s2051_s28, %s2474_s3 }
 0x23e   :  { %p2057_p3 = pnand %p2055_p2, %p2052_p1 }
 0x240   :  { %2060 = shalt.err (!%p2057_p3)
}
 0x241   :  { %1580 = dma.vmem_to_hbm [thread:$0]  %s2439_s12, 16, %s2474_s3, [#allocation9]  }
 0x242   :  { %2065 = dma.done.wait [#allocation4], 16  }
 0x243   :  { %2066 = vsyncadd [#allocation4], 4294967280 }
 0x244   :  { %2067 = dma.done.wait [#allocation9], 16  }
 0x245   :  { %2068 = vsyncadd [#allocation9], 4294967280 }
 0x246   :  { %1587 = vsyncpa [#allocation3], 1 }
 0x247   :  { %1588 = vsyncpa [#allocation6], 1 }
 0x248   :  { %1589 = vsyncpa [#allocation4], 1 }
 0x249   :  { %1590 = vsyncpa [#allocation9], 1 }

</bundles_post_ra>
